<compile_context>
chip_gen: v7x
topology: tpu7x:2x2x1
jax: 0.10.0
libtpu: 0.0.40
codegen_flags: <defaults>
</compile_context>

<pallas_src>
import functools

import jax
import jax.numpy as jnp
from jax.experimental import pallas as pl
from jax.experimental.pallas import tpu as pltpu


# ----------------------------------------------------------------------------
# Pallas kernel: one tile of G_TILE graphs (TN = G_TILE * act_dim nodes)
# ----------------------------------------------------------------------------
def gnn_critic3_kernel(
    cat_ref,     # (TN, 22)       concatenated [state, action]   (pipelined, cdt)
    band_ref,    # (TN, act_dim)  banded normalized adjacency    (pipelined, cdt)
    rep_ref,     # (act_dim, TN)  lane-replication one-hot       (resident, cdt)
    mask_ref,    # (TN, TN)       block-diagonal mask            (resident, cdt)
    pool_t_ref,  # (TN, G_TILE)   per-graph pooling one-hot      (resident, f32)
    wg_ref,      # (22, 22)       GCNConv weight (x @ Wg)        (resident, cdt)
    bg_ref,      # (1, 22)  f32
    w1_ref,      # (22, H)        lin1                           (resident, cdt)
    b1_ref,      # (1, H)   f32
    w2_ref,      # (H, H)         lin2                           (resident, cdt)
    b2_ref,      # (1, H)   f32
    w3_ref,      # (1, H)   f32   lin3 weight as a row (lane reduce, no 1-col matmul)
    b3_ref,      # (1, 1)   f32
    out_ref,     # (1, 1, G_TILE) Q-values for the graphs in this tile
    *, g_tile,
):
    cdt = cat_ref.dtype
    cat = cat_ref[...]                                         # (TN, 22)

    # Re-expand the banded adjacency to the (TN, TN) block-diagonal slab in VMEM:
    # tiled[i, j] = band[i, j % act_dim], then zero everything off the block diagonal.
    slab = (jnp.dot(band_ref[...], rep_ref[...],
                    preferred_element_type=jnp.float32).astype(cdt)
            * mask_ref[...])                                   # (TN, TN), cdt

    # GCNConv (PyG order: transform -> propagate -> bias), then ReLU.
    xw = jnp.dot(cat, wg_ref[...], preferred_element_type=jnp.float32)
    h = jnp.dot(slab, xw.astype(cdt),
                preferred_element_type=jnp.float32) + bg_ref[...]
    h = jnp.maximum(h, 0.0)

    x = h + cat.astype(jnp.float32)                            # residual, (TN, 22) f32

    # MLP on every node (MXU in compute dtype, f32 accumulation + f32 epilogue).
    x = jnp.maximum(
        jnp.dot(x.astype(cdt), w1_ref[...],
                preferred_element_type=jnp.float32) + b1_ref[...], 0.0)
    x = jnp.maximum(
        jnp.dot(x.astype(cdt), w2_ref[...],
                preferred_element_type=jnp.float32) + b2_ref[...], 0.0)

    # lin3 before the readout (both are linear): per-node scalar via a lane reduce,
    # then per-graph sum via a masked sublane reduce against the resident one-hot.
    q_node = jnp.sum(x * w3_ref[...], axis=-1, keepdims=True)          # (TN, 1)
    q_row = jnp.sum(q_node * pool_t_ref[...], axis=0, keepdims=True) \
        + b3_ref[...]                                                  # (1, G_TILE)
    out_ref[...] = q_row.reshape(1, 1, g_tile)


# ----------------------------------------------------------------------------
# Graph-structure glue (precompute once for a static graph)
# ----------------------------------------------------------------------------
def _round_up(x, m):
    return ((x + m - 1) // m) * m


def pick_g_tile(num_graphs, act_dim, target_nodes=384, min_tiles=8):
    """Per-grid-step graph-tile size (always a multiple of 8).

    Tiny batches: one whole-batch tile.  Large batches: tiles of ~target_nodes
    nodes, but keep >= min_tiles grid steps so the auto-pipeline (and the v7x
    megacore split) has iterations to overlap.
    """
    b8 = _round_up(num_graphs, 8)
    g_cap = max(8, (target_nodes // act_dim) // 8 * 8)
    if b8 <= g_cap:
        return b8
    return min(g_cap, max(8, _round_up(-(-num_graphs // min_tiles), 8)))


def gcn_norm_per_graph(edge_index, num_graphs, act_dim):
    """Per-graph A_hat = D^-1/2 (A + I) D^-1/2, unit edge weights, self loops."""
    src, dst = edge_index[0], edge_index[1]
    g = dst // act_dim
    li = dst % act_dim
    lj = src % act_dim
    adj = jnp.zeros((num_graphs, act_dim, act_dim), jnp.float32).at[g, li, lj].add(1.0)
    adj = adj + jnp.eye(act_dim, dtype=jnp.float32)[None]
    deg = jnp.sum(adj, axis=-1)
    dinv = jnp.where(deg > 0, 1.0 / jnp.sqrt(deg), 0.0)
    return adj * dinv[:, :, None] * dinv[:, None, :]


def prepare_graph(edge_index, num_graphs, act_dim, g_tile=None,
                  compute_dtype=jnp.float32, validate=True):
    """Everything that depends only on the (static) graph: call once, reuse per step."""
    if g_tile is None:
        g_tile = pick_g_tile(num_graphs, act_dim)
    assert g_tile % 8 == 0
    if validate:  # requires a concrete edge_index (eager call)
        same = jnp.all(edge_index[0] // act_dim == edge_index[1] // act_dim)
        if not bool(same):
            raise ValueError("edge_index has cross-sample edges; block-diagonal "
                             "batched (banded) adjacency does not apply.")

    b_pad = _round_up(num_graphs, g_tile)
    tn = g_tile * act_dim
    n_pad = b_pad * act_dim

    a_graph = gcn_norm_per_graph(edge_index, num_graphs, act_dim)    # (B, ad, ad)
    band = a_graph.reshape(num_graphs * act_dim, act_dim)            # (N, ad)
    if n_pad > band.shape[0]:
        band = jnp.concatenate(
            [band, jnp.zeros((n_pad - band.shape[0], act_dim), band.dtype)], axis=0)
    band = band.astype(compute_dtype)

    gid = jnp.arange(tn) // act_dim
    rep = (jnp.arange(tn)[None, :] % act_dim
           == jnp.arange(act_dim)[:, None]).astype(compute_dtype)    # (ad, TN)
    mask = (gid[:, None] == gid[None, :]).astype(compute_dtype)      # (TN, TN)
    pool_t = (gid[:, None] == jnp.arange(g_tile)[None, :]).astype(jnp.float32)

    return dict(g_tile=g_tile, b_pad=b_pad, n_pad=n_pad, tn=tn,
                num_graphs=num_graphs, act_dim=act_dim, compute_dtype=compute_dtype,
                band=band, rep=rep, mask=mask, pool_t=pool_t)


# ----------------------------------------------------------------------------
# Wrapper
# ----------------------------------------------------------------------------
def gnn_critic3_forward(state, edge_index, action, params, act_dim=6,
                        g_tile=None, graph=None, compute_dtype=jnp.float32):
    N, f_state = state.shape
    assert N % act_dim == 0
    f_in = f_state + 1                      # 22
    B = N // act_dim

    if graph is None:
        graph = prepare_graph(edge_index, B, act_dim, g_tile=g_tile,
                              compute_dtype=compute_dtype)
    g_tile = graph["g_tile"]
    tn, n_pad, b_pad = graph["tn"], graph["n_pad"], graph["b_pad"]
    num_tiles = b_pad // g_tile
    cdt = graph["compute_dtype"]

    cat = jnp.concatenate([state, action[:, None]], axis=-1).astype(cdt)
    if n_pad > N:
        # Padded graphs produce garbage rows that are dropped below ([:B]).
        cat = jnp.concatenate([cat, jnp.zeros((n_pad - N, f_in), cdt)], axis=0)

    wg, bg, w1, b1, w2, b2, w3, b3 = params
    hidden = w1.shape[1]

    kernel = functools.partial(gnn_critic3_kernel, g_tile=g_tile)
    out = pl.pallas_call(
        kernel,
        out_shape=jax.ShapeDtypeStruct((num_tiles, 1, g_tile), jnp.float32),
        grid=(num_tiles,),
        in_specs=[
            pl.BlockSpec((tn, f_in), lambda i: (i, 0)),            # cat     (pipelined)
            pl.BlockSpec((tn, act_dim), lambda i: (i, 0)),         # band    (pipelined)
            pl.BlockSpec((act_dim, tn), lambda i: (0, 0)),         # rep     (resident)
            pl.BlockSpec((tn, tn), lambda i: (0, 0)),              # mask    (resident)
            pl.BlockSpec((tn, g_tile), lambda i: (0, 0)),          # pool_t  (resident)
            pl.BlockSpec((f_in, f_in), lambda i: (0, 0)),          # Wg
            pl.BlockSpec((1, f_in), lambda i: (0, 0)),             # bg
            pl.BlockSpec((f_in, hidden), lambda i: (0, 0)),        # W1
            pl.BlockSpec((1, hidden), lambda i: (0, 0)),           # b1
            pl.BlockSpec((hidden, hidden), lambda i: (0, 0)),      # W2
            pl.BlockSpec((1, hidden), lambda i: (0, 0)),           # b2
            pl.BlockSpec((1, hidden), lambda i: (0, 0)),           # w3 row
            pl.BlockSpec((1, 1), lambda i: (0, 0)),                # b3
        ],
        out_specs=pl.BlockSpec((1, 1, g_tile), lambda i: (i, 0, 0)),
        compiler_params=pltpu.CompilerParams(
            # Independent graph tiles -> megacore-shard the grid on v7x.
            dimension_semantics=("parallel",),
        ),
    )(
        cat, graph["band"], graph["rep"], graph["mask"], graph["pool_t"],
        wg.astype(cdt), bg.reshape(1, -1).astype(jnp.float32),
        w1.astype(cdt), b1.reshape(1, -1).astype(jnp.float32),
        w2.astype(cdt), b2.reshape(1, -1).astype(jnp.float32),
        w3.reshape(1, -1).astype(jnp.float32),
        b3.reshape(1, 1).astype(jnp.float32),
    )
    return out.reshape(b_pad)[:B]           # drop padded graphs, .squeeze(-1)


# ----------------------------------------------------------------------------
# Pure-JAX reference (mirrors the PyTorch forward, full dense adjacency)
# ----------------------------------------------------------------------------
def gcn_norm_dense(edge_index, num_nodes):
    src, dst = edge_index[0], edge_index[1]
    adj = jnp.zeros((num_nodes, num_nodes), dtype=jnp.float32)
    adj = adj.at[dst, src].add(1.0)
    adj = adj + jnp.eye(num_nodes, dtype=jnp.float32)
    deg = jnp.sum(adj, axis=1)
    dis = jnp.where(deg > 0, 1.0 / jnp.sqrt(deg), 0.0)
    return adj * dis[:, None] * dis[None, :]


def reference_forward(state, edge_index, action, params, act_dim=6):
    wg, bg, w1, b1, w2, b2, w3, b3 = params
    N = state.shape[0]
    cat = jnp.concatenate([state, action[:, None]], axis=-1)
    a_hat = gcn_norm_dense(edge_index, N)
    out = jax.nn.relu(a_hat @ (cat @ wg) + bg)
    x = out + cat
    x = x.reshape(-1, act_dim, 22)
    x = jax.nn.relu(x @ w1 + b1)
    x = jax.nn.relu(x @ w2 + b2)
    x = jnp.sum(x, axis=1)
    x = (x @ w3 + b3)[..., 0]
    return x


# ----------------------------------------------------------------------------
def init_params(key, hidden_size=32):
    ks = jax.random.split(key, 8)

    def lin(kw, fan_in, fan_out):
        bound = 1.0 / jnp.sqrt(fan_in)
        return jax.random.uniform(kw, (fan_in, fan_out), jnp.float32, -bound, bound)

    wg = lin(ks[0], 22, 22)
    bg = jax.random.uniform(ks[1], (22,), jnp.float32, -0.1, 0.1)
    w1 = lin(ks[2], 22, hidden_size)
    b1 = jax.random.uniform(ks[3], (hidden_size,), jnp.float32, -0.1, 0.1)
    w2 = lin(ks[4], hidden_size, hidden_size)
    b2 = jax.random.uniform(ks[5], (hidden_size,), jnp.float32, -0.1, 0.1)
    w3 = lin(ks[6], hidden_size, 1)
    b3 = jax.random.uniform(ks[7], (1,), jnp.float32, -0.1, 0.1)
    return (wg, bg, w1, b1, w2, b2, w3, b3)


def make_ring_batch(batch, act_dim, key):
    """PyG-style batched graph: bidirectional ring inside every act_dim-node sample."""
    k_state, k_act = jax.random.split(key)
    N = batch * act_dim
    state = jax.random.normal(k_state, (N, 21), jnp.float32)
    action = jax.random.uniform(k_act, (N,), jnp.float32)
    base = jnp.arange(batch) * act_dim
    loc = jnp.arange(act_dim)
    s_loc = jnp.concatenate([loc, (loc + 1) % act_dim])
    d_loc = jnp.concatenate([(loc + 1) % act_dim, loc])
    src = (base[:, None] + s_loc[None, :]).reshape(-1)
    dst = (base[:, None] + d_loc[None, :]).reshape(-1)
    edge_index = jnp.stack([src, dst], axis=0).astype(jnp.int32)
    return state, action, edge_index


if __name__ == "__main__":
    key = jax.random.PRNGKey(0)
    k_data, k_data2, k_par = jax.random.split(key, 3)

    act_dim = 6
    hidden = 32
    params = init_params(k_par, hidden_size=hidden)

    # --- test 1: batch=16, whole batch as a single tile (g_tile auto = 16) -------
    batch = 16
    state, action, edge_index = make_ring_batch(batch, act_dim, k_data)
    graph = prepare_graph(edge_index, batch, act_dim)      # static-graph precompute
    q = gnn_critic3_forward(state, edge_index, action, params,
                            act_dim=act_dim, graph=graph)
    jax.block_until_ready(q)
    q_ref = reference_forward(state, edge_index, action, params, act_dim=act_dim)
    assert q.shape == (batch,)
    assert jnp.allclose(q, q_ref, atol=1e-3, rtol=1e-3), (q, q_ref)

    # --- test 2: batch=20 with g_tile=8 -> 3-step pipelined grid + graph padding -
    batch2 = 20
    state2, action2, edge_index2 = make_ring_batch(batch2, act_dim, k_data2)
    q2 = gnn_critic3_forward(state2, edge_index2, action2, params,
                             act_dim=act_dim, g_tile=8)
    jax.block_until_ready(q2)
    q2_ref = reference_forward(state2, edge_index2, action2, params, act_dim=act_dim)
    assert q2.shape == (batch2,)
    assert jnp.allclose(q2, q2_ref, atol=1e-3, rtol=1e-3), (q2, q2_ref)

    print("KERNEL_OK")
</pallas_src>

<mosaic_0001>
module attributes {stable_mosaic.version = 11 : i64} {
  func.func @gnn_critic3_kernel(%arg0: i32, %arg1: memref<96x22xf32, #tpu.memory_space<vmem>>, %arg2: memref<96x6xf32, #tpu.memory_space<vmem>>, %arg3: memref<6x96xf32, #tpu.memory_space<vmem>>, %arg4: memref<96x96xf32, #tpu.memory_space<vmem>>, %arg5: memref<96x16xf32, #tpu.memory_space<vmem>>, %arg6: memref<22x22xf32, #tpu.memory_space<vmem>>, %arg7: memref<1x22xf32, #tpu.memory_space<vmem>>, %arg8: memref<22x32xf32, #tpu.memory_space<vmem>>, %arg9: memref<1x32xf32, #tpu.memory_space<vmem>>, %arg10: memref<32x32xf32, #tpu.memory_space<vmem>>, %arg11: memref<1x32xf32, #tpu.memory_space<vmem>>, %arg12: memref<1x32xf32, #tpu.memory_space<vmem>>, %arg13: memref<1x1xf32, #tpu.memory_space<vmem>>, %arg14: memref<1x1x16xf32, #tpu.memory_space<vmem>>) attributes {dimension_semantics = [#tpu.dimension_semantics<parallel>], iteration_bounds = array<i64: 1>, scalar_prefetch = 0 : i64, scratch_operands = 0 : i64, tpu.core_type = #tpu.core_type<tc>, window_params = [{transform_indices = @transform_0, window_bounds = array<i64: 96, 22>}, {transform_indices = @transform_1, window_bounds = array<i64: 96, 6>}, {pipeline_mode = #tpu.pipeline_mode<synchronous>, transform_indices = @transform_2, window_bounds = array<i64: 6, 96>}, {pipeline_mode = #tpu.pipeline_mode<synchronous>, transform_indices = @transform_3, window_bounds = array<i64: 96, 96>}, {pipeline_mode = #tpu.pipeline_mode<synchronous>, transform_indices = @transform_4, window_bounds = array<i64: 96, 16>}, {pipeline_mode = #tpu.pipeline_mode<synchronous>, transform_indices = @transform_5, window_bounds = array<i64: 22, 22>}, {pipeline_mode = #tpu.pipeline_mode<synchronous>, transform_indices = @transform_6, window_bounds = array<i64: 1, 22>}, {pipeline_mode = #tpu.pipeline_mode<synchronous>, transform_indices = @transform_7, window_bounds = array<i64: 22, 32>}, {pipeline_mode = #tpu.pipeline_mode<synchronous>, transform_indices = @transform_8, window_bounds = array<i64: 1, 32>}, {pipeline_mode = #tpu.pipeline_mode<synchronous>, transform_indices = @transform_9, window_bounds = array<i64: 32, 32>}, {pipeline_mode = #tpu.pipeline_mode<synchronous>, transform_indices = @transform_10, window_bounds = array<i64: 1, 32>}, {pipeline_mode = #tpu.pipeline_mode<synchronous>, transform_indices = @transform_11, window_bounds = array<i64: 1, 32>}, {pipeline_mode = #tpu.pipeline_mode<synchronous>, transform_indices = @transform_12, window_bounds = array<i64: 1, 1>}, {transform_indices = @transform_13, window_bounds = array<i64: 1, 1, 16>}]} {
    %c0 = arith.constant 0 : index
    %c0_0 = arith.constant 0 : index
    %0 = vector.load %arg1[%c0, %c0_0] : memref<96x22xf32, #tpu.memory_space<vmem>>, vector<96x22xf32>
    %c0_1 = arith.constant 0 : index
    %c0_2 = arith.constant 0 : index
    %1 = vector.load %arg2[%c0_1, %c0_2] : memref<96x6xf32, #tpu.memory_space<vmem>>, vector<96x6xf32>
    %c0_3 = arith.constant 0 : index
    %c0_4 = arith.constant 0 : index
    %2 = vector.load %arg3[%c0_3, %c0_4] : memref<6x96xf32, #tpu.memory_space<vmem>>, vector<6x96xf32>
    %cst = arith.constant dense<0.000000e+00> : vector<96x96xf32>
    %3 = tpu.matmul %1, %2, %cst {dimension_numbers = #tpu.dot_dimension_numbers<[1], [0], [0], [1], [0, 0, 1, 1], [], []>} : vector<96x6xf32>, vector<6x96xf32>, vector<96x96xf32> -> vector<96x96xf32>
    %c0_5 = arith.constant 0 : index
    %c0_6 = arith.constant 0 : index
    %4 = vector.load %arg4[%c0_5, %c0_6] : memref<96x96xf32, #tpu.memory_space<vmem>>, vector<96x96xf32>
    %5 = arith.mulf %3, %4 : vector<96x96xf32>
    %c0_7 = arith.constant 0 : index
    %c0_8 = arith.constant 0 : index
    %6 = vector.load %arg6[%c0_7, %c0_8] : memref<22x22xf32, #tpu.memory_space<vmem>>, vector<22x22xf32>
    %cst_9 = arith.constant dense<0.000000e+00> : vector<96x22xf32>
    %7 = tpu.matmul %0, %6, %cst_9 {dimension_numbers = #tpu.dot_dimension_numbers<[1], [0], [0], [1], [0, 0, 1, 1], [], []>} : vector<96x22xf32>, vector<22x22xf32>, vector<96x22xf32> -> vector<96x22xf32>
    %cst_10 = arith.constant dense<0.000000e+00> : vector<96x22xf32>
    %8 = tpu.matmul %5, %7, %cst_10 {dimension_numbers = #tpu.dot_dimension_numbers<[1], [0], [0], [1], [0, 0, 1, 1], [], []>} : vector<96x96xf32>, vector<96x22xf32>, vector<96x22xf32> -> vector<96x22xf32>
    %c0_11 = arith.constant 0 : index
    %c0_12 = arith.constant 0 : index
    %9 = vector.load %arg7[%c0_11, %c0_12] : memref<1x22xf32, #tpu.memory_space<vmem>>, vector<1x22xf32>
    %10 = vector.broadcast %9 : vector<1x22xf32> to vector<96x22xf32>
    %11 = arith.addf %8, %10 : vector<96x22xf32>
    %cst_13 = arith.constant 0.000000e+00 : f32
    %12 = vector.broadcast %cst_13 : f32 to vector<96x22xf32>
    %13 = arith.maximumf %11, %12 : vector<96x22xf32>
    %14 = arith.addf %13, %0 : vector<96x22xf32>
    %c0_14 = arith.constant 0 : index
    %c0_15 = arith.constant 0 : index
    %15 = vector.load %arg8[%c0_14, %c0_15] : memref<22x32xf32, #tpu.memory_space<vmem>>, vector<22x32xf32>
    %cst_16 = arith.constant dense<0.000000e+00> : vector<96x32xf32>
    %16 = tpu.matmul %14, %15, %cst_16 {dimension_numbers = #tpu.dot_dimension_numbers<[1], [0], [0], [1], [0, 0, 1, 1], [], []>} : vector<96x22xf32>, vector<22x32xf32>, vector<96x32xf32> -> vector<96x32xf32>
    %c0_17 = arith.constant 0 : index
    %c0_18 = arith.constant 0 : index
    %17 = vector.load %arg9[%c0_17, %c0_18] : memref<1x32xf32, #tpu.memory_space<vmem>>, vector<1x32xf32>
    %18 = vector.broadcast %17 : vector<1x32xf32> to vector<96x32xf32>
    %19 = arith.addf %16, %18 : vector<96x32xf32>
    %cst_19 = arith.constant 0.000000e+00 : f32
    %20 = vector.broadcast %cst_19 : f32 to vector<96x32xf32>
    %21 = arith.maximumf %19, %20 : vector<96x32xf32>
    %c0_20 = arith.constant 0 : index
    %c0_21 = arith.constant 0 : index
    %22 = vector.load %arg10[%c0_20, %c0_21] : memref<32x32xf32, #tpu.memory_space<vmem>>, vector<32x32xf32>
    %cst_22 = arith.constant dense<0.000000e+00> : vector<96x32xf32>
    %23 = tpu.matmul %21, %22, %cst_22 {dimension_numbers = #tpu.dot_dimension_numbers<[1], [0], [0], [1], [0, 0, 1, 1], [], []>} : vector<96x32xf32>, vector<32x32xf32>, vector<96x32xf32> -> vector<96x32xf32>
    %c0_23 = arith.constant 0 : index
    %c0_24 = arith.constant 0 : index
    %24 = vector.load %arg11[%c0_23, %c0_24] : memref<1x32xf32, #tpu.memory_space<vmem>>, vector<1x32xf32>
    %25 = vector.broadcast %24 : vector<1x32xf32> to vector<96x32xf32>
    %26 = arith.addf %23, %25 : vector<96x32xf32>
    %cst_25 = arith.constant 0.000000e+00 : f32
    %27 = vector.broadcast %cst_25 : f32 to vector<96x32xf32>
    %28 = arith.maximumf %26, %27 : vector<96x32xf32>
    %c0_26 = arith.constant 0 : index
    %c0_27 = arith.constant 0 : index
    %29 = vector.load %arg12[%c0_26, %c0_27] : memref<1x32xf32, #tpu.memory_space<vmem>>, vector<1x32xf32>
    %30 = vector.broadcast %29 : vector<1x32xf32> to vector<96x32xf32>
    %31 = arith.mulf %28, %30 : vector<96x32xf32>
    %cst_28 = arith.constant dense<0.000000e+00> : vector<96xf32>
    %32 = vector.multi_reduction <add>, %31, %cst_28 [1] : vector<96x32xf32> to vector<96xf32>
    %33 = vector.shape_cast %32 : vector<96xf32> to vector<96x1xf32>
    %c0_29 = arith.constant 0 : index
    %c0_30 = arith.constant 0 : index
    %34 = vector.load %arg5[%c0_29, %c0_30] : memref<96x16xf32, #tpu.memory_space<vmem>>, vector<96x16xf32>
    %35 = vector.broadcast %33 : vector<96x1xf32> to vector<96x16xf32>
    %36 = arith.mulf %35, %34 : vector<96x16xf32>
    %cst_31 = arith.constant dense<0.000000e+00> : vector<16xf32>
    %37 = vector.multi_reduction <add>, %36, %cst_31 [0] : vector<96x16xf32> to vector<16xf32>
    %38 = vector.shape_cast %37 : vector<16xf32> to vector<1x16xf32>
    %c0_32 = arith.constant 0 : index
    %c0_33 = arith.constant 0 : index
    %39 = vector.load %arg13[%c0_32, %c0_33] : memref<1x1xf32, #tpu.memory_space<vmem>>, vector<1x1xf32>
    %40 = vector.broadcast %39 : vector<1x1xf32> to vector<1x16xf32>
    %41 = arith.addf %38, %40 : vector<1x16xf32>
    %42 = vector.shape_cast %41 : vector<1x16xf32> to vector<1x1x16xf32>
    %c0_34 = arith.constant 0 : index
    %c0_35 = arith.constant 0 : index
    %c0_36 = arith.constant 0 : index
    %43 = vector.load %arg14[%c0_34, %c0_35, %c0_36] : memref<1x1x16xf32, #tpu.memory_space<vmem>>, vector<1x1x16xf32>
    tpu.vector_store %arg14[%c0_34, %c0_35, %c0_36], %42 {strides = array<i32>} : memref<1x1x16xf32, #tpu.memory_space<vmem>>, vector<1x1x16xf32>,
    return
  }
  func.func @transform_0(%arg0: i32) -> (i32, i32) {
    %c0_i32 = arith.constant 0 : i32
    %c0_i32_0 = arith.constant 0 : i32
    return %arg0, %c0_i32 : i32, i32
  }
  func.func @transform_1(%arg0: i32) -> (i32, i32) {
    %c0_i32 = arith.constant 0 : i32
    %c0_i32_0 = arith.constant 0 : i32
    return %arg0, %c0_i32 : i32, i32
  }
  func.func @transform_2(%arg0: i32) -> (i32, i32) {
    %c0_i32 = arith.constant 0 : i32
    %c0_i32_0 = arith.constant 0 : i32
    %c0_i32_1 = arith.constant 0 : i32
    return %c0_i32, %c0_i32_0 : i32, i32
  }
  func.func @transform_3(%arg0: i32) -> (i32, i32) {
    %c0_i32 = arith.constant 0 : i32
    %c0_i32_0 = arith.constant 0 : i32
    %c0_i32_1 = arith.constant 0 : i32
    return %c0_i32, %c0_i32_0 : i32, i32
  }
  func.func @transform_4(%arg0: i32) -> (i32, i32) {
    %c0_i32 = arith.constant 0 : i32
    %c0_i32_0 = arith.constant 0 : i32
    %c0_i32_1 = arith.constant 0 : i32
    return %c0_i32, %c0_i32_0 : i32, i32
  }
  func.func @transform_5(%arg0: i32) -> (i32, i32) {
    %c0_i32 = arith.constant 0 : i32
    %c0_i32_0 = arith.constant 0 : i32
    %c0_i32_1 = arith.constant 0 : i32
    return %c0_i32, %c0_i32_0 : i32, i32
  }
  func.func @transform_6(%arg0: i32) -> (i32, i32) {
    %c0_i32 = arith.constant 0 : i32
    %c0_i32_0 = arith.constant 0 : i32
    %c0_i32_1 = arith.constant 0 : i32
    return %c0_i32, %c0_i32_0 : i32, i32
  }
  func.func @transform_7(%arg0: i32) -> (i32, i32) {
    %c0_i32 = arith.constant 0 : i32
    %c0_i32_0 = arith.constant 0 : i32
    %c0_i32_1 = arith.constant 0 : i32
    return %c0_i32, %c0_i32_0 : i32, i32
  }
  func.func @transform_8(%arg0: i32) -> (i32, i32) {
    %c0_i32 = arith.constant 0 : i32
    %c0_i32_0 = arith.constant 0 : i32
    %c0_i32_1 = arith.constant 0 : i32
    return %c0_i32, %c0_i32_0 : i32, i32
  }
  func.func @transform_9(%arg0: i32) -> (i32, i32) {
    %c0_i32 = arith.constant 0 : i32
    %c0_i32_0 = arith.constant 0 : i32
    %c0_i32_1 = arith.constant 0 : i32
    return %c0_i32, %c0_i32_0 : i32, i32
  }
  func.func @transform_10(%arg0: i32) -> (i32, i32) {
    %c0_i32 = arith.constant 0 : i32
    %c0_i32_0 = arith.constant 0 : i32
    %c0_i32_1 = arith.constant 0 : i32
    return %c0_i32, %c0_i32_0 : i32, i32
  }
  func.func @transform_11(%arg0: i32) -> (i32, i32) {
    %c0_i32 = arith.constant 0 : i32
    %c0_i32_0 = arith.constant 0 : i32
    %c0_i32_1 = arith.constant 0 : i32
    return %c0_i32, %c0_i32_0 : i32, i32
  }
  func.func @transform_12(%arg0: i32) -> (i32, i32) {
    %c0_i32 = arith.constant 0 : i32
    %c0_i32_0 = arith.constant 0 : i32
    %c0_i32_1 = arith.constant 0 : i32
    return %c0_i32, %c0_i32_0 : i32, i32
  }
  func.func @transform_13(%arg0: i32) -> (i32, i32, i32) {
    %c0_i32 = arith.constant 0 : i32
    %c0_i32_0 = arith.constant 0 : i32
    %c0_i32_1 = arith.constant 0 : i32
    return %arg0, %c0_i32, %c0_i32_0 : i32, i32, i32
  }
}

</mosaic_0001>

<bundles_post_ra>
// kernel: tpu_custom_call.1
= control target key start
LH: loop header
LB: loop body
LE: loop exit
PB: predicated region body
PF: predicated region fallthrough
CT: control target
= control target key end

     0   :  { %s1932_s0 = inlined_call_operand.vmem [shape: f32[96,22], index: 0, kind: input, shape index: {}]   ;;  %s1933_s1 = inlined_call_operand.vmem [shape: f32[96,6], index: 1, kind: input, shape index: {}]   ;;  %s1934_s2 = inlined_call_operand.vmem [shape: f32[6,96], index: 2, kind: input, shape index: {}]   ;;  %s1935_s3 = inlined_call_operand.vmem [shape: f32[96,96], index: 3, kind: input, shape index: {}]   ;;  %s1936_s4 = inlined_call_operand.vmem [shape: f32[96,16], index: 4, kind: input, shape index: {}]   ;;  %s1937_s5 = inlined_call_operand.vmem [shape: f32[22,22], index: 5, kind: input, shape index: {}]   ;;  %s1938_s6 = inlined_call_operand.vmem [shape: f32[1,22], index: 6, kind: input, shape index: {}]   ;;  %s1939_s7 = inlined_call_operand.vmem [shape: f32[22,32], index: 7, kind: input, shape index: {}]   ;;  %s1940_s8 = inlined_call_operand.vmem [shape: f32[1,32], index: 8, kind: input, shape index: {}]   ;;  %s1941_s9 = inlined_call_operand.vmem [shape: f32[32,32], index: 9, kind: input, shape index: {}]   ;;  %s1942_s10 = inlined_call_operand.vmem [shape: f32[1,32], index: 10, kind: input, shape index: {}]   ;;  %s1943_s11 = inlined_call_operand.vmem [shape: f32[1,32], index: 11, kind: input, shape index: {}]   ;;  %s1944_s12 = inlined_call_operand.<no memory space> [shape: f32[1,1], index: 12, kind: input, shape index: {}]   ;;  %s1945_s13 = inlined_call_operand.hbm [shape: f32[1,1,16], index: 13, kind: output, shape index: {}]  }
   0x1   :  { %v18_v0 = vstv %s1944_s12 }
   0x2   :  { %19 = vst [vmem:[#allocation2] sm:$0x1] %v18_v0 }
   0x3   :  { %v262_v1 = vld [vmem:[%s1937_s5] sm:$0xff]  ;;  %v263_v2 = vld [vmem:[%s1937_s5 + $0x8] sm:$0xff]  ;;  %vm265_vm0 = vcmask 179200   ;;  %vm109_vm1 = vcmask 1045504   ;;  %v264_v5 = vld [vmem:[%s1937_s5 + $0x10] sm:$0x3f] }
   0x4   :  { %v1416_v3 = vpack.c.bf16 %v263_v2, %v262_v1  ;;  %v1579_v4 = vld [vmem:[%s1932_s0] sm:$0xff]  ;;  %vm72_vm2 = vcmask 48128   ;;  %v60_v8 = vld [vmem:[%s1933_s1 + $0x8] sm:$0xff]  ;;  %v61_v10 = vld [vmem:[%s1933_s1 + $0x10] sm:$0xff] }
   0x5   :  { %1306 = vmatprep.mubr.msk.f32.mxu1 %vm265_vm0, %v1579_v4  ;;  %v71_v6 = vld [vmem:[%s1934_s2] sm:$0x3f]  ;;  %v1599_v9 = vld [vmem:[%s1932_s0 + $0x8] sm:$0xff]  ;;  %v1609_v11 = vld [vmem:[%s1932_s0 + $0x10] sm:$0xff] }
   0x6   :  { %1417 = vmatprep.subr.bf16.mxu1 %v1416_v3  ;;  %v59_v7 = vld [vmem:[%s1933_s1] sm:$0xff]  ;;  %1280 = vmatprep.subr.msk.mxu0 %vm109_vm1, %v71_v6  ;;  %v62_v12 = vld [vmem:[%s1933_s1 + $0x18] sm:$0xff] }
   0x7   :  { %1419 = vmatpush3.bf16.msra.mxu1 %v1416_v3  ;;  %1282 = vmatprep.mubr.msk.f32.mxu0 %vm72_vm2, %v59_v7 }
   0x8   :  { %1304 = vmatprep.subr.msk.mxu1 %vm109_vm1, %v264_v5  ;;  %1281 = vmatpush3.msk.msra.mxu0 %vm109_vm1, %v71_v6 }
   0x9   :  { %1283 = vmatmul.mubr.msk.f32.vlgmr.msra.gmra.mrb[0].mxu0 %vm72_vm2, %v60_v8 }
   0xa   :  { %1285 = vmatprep.mubr.msk.f32.mxu0 %vm72_vm2, %v61_v10 }
   0xb   :  { %1305 = vmatpush3.msk.msra.mxu1 %vm109_vm1, %v264_v5 }
   0xc   :  { %1307 = vmatmul.mubr.msk.f32.vlgmr.msra.gmra.mrb[0].mxu1 %vm265_vm0, %v1599_v9 }
   0xd   :  { %20 = vsyncpa [#allocation4], 0  ;;  %1309 = vmatprep.mubr.msk.f32.mxu1 %vm265_vm0, %v1609_v11  ;;  %v1625_v13 = vld [vmem:[%s1932_s0 + $0x18] sm:$0xff]  ;;  %v63_v14 = vld [vmem:[%s1933_s1 + $0x20] sm:$0xff]  ;;  %1286 = vmatmul.mubr.msk.f32.gmra.mrb[2].mxu0 %vm72_vm2, %v62_v12  ;;  %vm437_vm3 = vcmask 785408   ;;  %vm820_vm4 = vcmask 261120  }
   0xe   :  { %v1633_v15 = vld [vmem:[%s1932_s0 + $0x20] sm:$0xff]  ;;  %1288 = vmatprep.mubr.msk.f32.mxu0 %vm72_vm2, %v63_v14  ;;  %v64_v16 = vld [vmem:[%s1933_s1 + $0x28] sm:$0xff]  ;;  %v65_v18 = vld [vmem:[%s1933_s1 + $0x30] sm:$0xff]  ;;  %vm1073_vm5 = vcmask 130048   ;;  %vm1114_vm6 = vcmask 122880  }
   0xf   :  { %v1647_v17 = vld [vmem:[%s1932_s0 + $0x28] sm:$0xff]  ;;  %v1655_v19 = vld [vmem:[%s1932_s0 + $0x30] sm:$0xff]  ;;  %v66_v20 = vld [vmem:[%s1933_s1 + $0x38] sm:$0xff] }
  0x10   :  { %1310 = vmatmul.mubr.msk.f32.gmra.mrb[2].mxu1 %vm265_vm0, %v1625_v13  ;;  %v1669_v21 = vld [vmem:[%s1932_s0 + $0x38] sm:$0xff]  ;;  %v67_v22 = vld [vmem:[%s1933_s1 + $0x40] sm:$0xff]  ;;  %v68_v24 = vld [vmem:[%s1933_s1 + $0x48] sm:$0xff] }
  0x11   :  { %1312 = vmatprep.mubr.msk.f32.mxu1 %vm265_vm0, %v1633_v15  ;;  %1289 = vmatmul.mubr.msk.f32.gmra.mrb[4].mxu0 %vm72_vm2, %v64_v16  ;;  %v1677_v23 = vld [vmem:[%s1932_s0 + $0x40] sm:$0xff]  ;;  %v1691_v25 = vld [vmem:[%s1932_s0 + $0x48] sm:$0xff]  ;;  %v69_v26 = vld [vmem:[%s1933_s1 + $0x50] sm:$0xff] }
  0x12   :  { %1291 = vmatprep.mubr.msk.f32.mxu0 %vm72_vm2, %v65_v18  ;;  %v1699_v27 = vld [vmem:[%s1932_s0 + $0x50] sm:$0xff]  ;;  %v70_v28 = vld [vmem:[%s1933_s1 + $0x58] sm:$0xff]  ;;  %v238_v30 = vld [vmem:[%s1935_s3] sm:$0xff] }
  0x13   :  { %v1713_v29 = vld [vmem:[%s1932_s0 + $0x58] sm:$0xff]  ;;  %v246_v52 = vld [vmem:[%s1935_s3 + $0x40] sm:$0xff]  ;;  %v247_v63 = vld [vmem:[%s1935_s3 + $0x48] sm:$0xff] }
  0x14   :  { %1313 = vmatmul.mubr.msk.f32.gmra.mrb[4].mxu1 %vm265_vm0, %v1647_v17  ;;  %v240_v1 = vld [vmem:[%s1935_s3 + $0x10] sm:$0xff]  ;;  %v239_v3 = vld [vmem:[%s1935_s3 + $0x8] sm:$0xff]  ;;  %v249_v7 = vld [vmem:[%s1935_s3 + $0x58] sm:$0xff] }
  0x15   :  { %1315 = vmatprep.mubr.msk.f32.mxu1 %vm265_vm0, %v1655_v19  ;;  %1292 = vmatmul.mubr.msk.f32.gmra.mrb[6].mxu0 %vm72_vm2, %v66_v20  ;;  %v248_v2 = vld [vmem:[%s1935_s3 + $0x50] sm:$0xff]  ;;  %v242_v12 = vld [vmem:[%s1935_s3 + $0x20] sm:$0xff]  ;;  %v241_v14 = vld [vmem:[%s1935_s3 + $0x18] sm:$0xff] }
  0x16   :  { %1294 = vmatprep.mubr.msk.f32.mxu0 %vm72_vm2, %v67_v22  ;;  %v243_v18 = vld [vmem:[%s1935_s3 + $0x28] sm:$0xff] }
  0x18   :  { %1316 = vmatmul.mubr.msk.f32.gmra.mrb[6].mxu1 %vm265_vm0, %v1669_v21 }
  0x19   :  { %1318 = vmatprep.mubr.msk.f32.mxu1 %vm265_vm0, %v1677_v23  ;;  %1295 = vmatmul.mubr.msk.f32.gmra.mrb[8].mxu0 %vm72_vm2, %v68_v24  ;;  %v244_v24 = vld [vmem:[%s1935_s3 + $0x30] sm:$0xff] }
  0x1a   :  { %1297 = vmatprep.mubr.msk.f32.mxu0 %vm72_vm2, %v69_v26 }
  0x1c   :  { %1319 = vmatmul.mubr.msk.f32.gmra.mrb[8].mxu1 %vm265_vm0, %v1691_v25 }
  0x1d   :  { %1321 = vmatprep.mubr.msk.f32.mxu1 %vm265_vm0, %v1699_v27  ;;  %1298 = vmatmul.mubr.msk.f32.gmra.mrb[10].mxu0 %vm72_vm2, %v70_v28  ;;  %v245_v28 = vld [vmem:[%s1935_s3 + $0x38] sm:$0xff] }
  0x20   :  { %1322 = vmatmul.mubr.msk.f32.gmra.mrb[10].mxu1 %vm265_vm0, %v1713_v29 }
  0xdc   :  { %v1721_v31 = vpop.f32.mrb[0].mxu0 }
  0xdd   :  { %v179_v33 = vpop.f32.mrb[1].mxu0  ;;  %v251_v10 = vmul.f32 %v1721_v31, %v239_v3 }
  0xde   :  { %v250_v35 = vmul.f32 %v238_v30, %v179_v33  ;;  %v624_v33 = vld [vmem:[%s1939_s7 + $0x8] sm:$0xff] }
  0xdf   :  { %v1308_v32 = vpop.f32.mrb[0].mxu1 }
  0xe0   :  { %v371_v34 = vpop.f32.mrb[1].mxu1  ;;  %v1723_v37 = vpop.f32.mrb[2].mxu0  ;;  %1348 = vmatprep.mubr.msk.f32.mxu0 %vm437_vm3, %v250_v35  ;;  %v625_v35 = vld [vmem:[%s1939_s7 + $0x10] sm:$0x3f] }
  0xe1   :  { %v1420_v36 = vpack.c.bf16 %v1308_v32, %v371_v34  ;;  %v189_v39 = vpop.f32.mrb[3].mxu0  ;;  %v253_v22 = vmul.f32 %v1723_v37, %v241_v14  ;;  %v623_v32 = vld [vmem:[%s1939_s7] sm:$0xff]  ;;  %v810_v37 = vld [vmem:[%s1941_s9 + $0x8] sm:$0xff] }
  0xe2   :  { %v252_v6 = vmul.f32 %v240_v1, %v189_v39  ;;  %v1444_v34 = vpack.c.bf16 %v624_v33, %v623_v32 }
  0xe3   :  { %v1311_v38 = vpop.f32.mrb[2].mxu1  ;;  %1421 = vmatprep.subr.bf16.mxu0 %v1420_v36  ;;  %1456 = vmatprep.subr.bf16.mxu1 %v1420_v36 }
  0xe4   :  { %v381_v40 = vpop.f32.mrb[3].mxu1  ;;  %1423 = vmatpush3.bf16.msra.mxu0 %v1420_v36  ;;  %1462 = vmatpush3.bf16.msra.mxu1 %v1420_v36  ;;  %v1726_v42 = vpop.f32.mrb[4].mxu0  ;;  %v809_v36 = vld [vmem:[%s1941_s9] sm:$0xff] }
  0xe5   :  { %v1424_v41 = vpack.c.bf16 %v1311_v38, %v381_v40  ;;  %v199_v44 = vpop.f32.mrb[5].mxu0  ;;  %v255_v26 = vmul.f32 %v1726_v42, %v243_v18  ;;  %v811_v38 = vld [vmem:[%s1941_s9 + $0x10] sm:$0xff]  ;;  %v1448_v39 = vpack.c.bf16 %v810_v37, %v809_v36  ;;  %v812_v40 = vld [vmem:[%s1941_s9 + $0x18] sm:$0xff]  ;;  %v1156_v42 = vld [vmem:[%s1938_s6] ss:$0 sm:$0xff] }
  0xe6   :  { %v254_v20 = vmul.f32 %v242_v12, %v199_v44 }
  0xe7   :  { %v1314_v43 = vpop.f32.mrb[4].mxu1  ;;  %1425 = vmatprep.subr.bf16.mxu0 %v1424_v41  ;;  %1457 = vmatprep.subr.bf16.mxu1 %v1424_v41 }
  0xe8   :  { %v391_v45 = vpop.f32.mrb[5].mxu1  ;;  %1427 = vmatpush3.bf16.msra.mxu0 %v1424_v41  ;;  %1463 = vmatpush3.bf16.msra.mxu1 %v1424_v41  ;;  %v1293_v47 = vpop.f32.mrb[6].mxu0  ;;  %v1452_v41 = vpack.c.bf16 %v812_v40, %v811_v38 }
  0xe9   :  { %v1428_v46 = vpack.c.bf16 %v1314_v43, %v391_v45  ;;  %v209_v49 = vpop.f32.mrb[7].mxu0  ;;  %v257_v31 = vmul.f32 %v1293_v47, %v245_v28 }
  0xea   :  { %v256_v30 = vmul.f32 %v244_v24, %v209_v49 }
  0xeb   :  { %v1317_v48 = vpop.f32.mrb[6].mxu1  ;;  %1429 = vmatprep.subr.bf16.mxu0 %v1428_v46  ;;  %1458 = vmatprep.subr.bf16.mxu1 %v1428_v46 }
  0xec   :  { %v401_v50 = vpop.f32.mrb[7].mxu1  ;;  %1431 = vmatpush3.bf16.msra.mxu0 %v1428_v46  ;;  %1464 = vmatpush3.bf16.msra.mxu1 %v1428_v46  ;;  %v1296_v53 = vpop.f32.mrb[8].mxu0 }
  0xed   :  { %v1432_v51 = vpack.c.bf16 %v1317_v48, %v401_v50  ;;  %v219_v55 = vpop.f32.mrb[9].mxu0  ;;  %v259_v5 = vmul.f32 %v1296_v53, %v247_v63 }
  0xee   :  { %v258_v57 = vmul.f32 %v246_v52, %v219_v55 }
  0xef   :  { %v1320_v54 = vpop.f32.mrb[8].mxu1  ;;  %1433 = vmatprep.subr.bf16.mxu0 %v1432_v51  ;;  %1459 = vmatprep.subr.bf16.mxu1 %v1432_v51 }
  0xf0   :  { %v411_v56 = vpop.f32.mrb[9].mxu1  ;;  %1435 = vmatpush3.bf16.msra.mxu0 %v1432_v51  ;;  %1465 = vmatpush3.bf16.msra.mxu1 %v1432_v51  ;;  %v1299_v59 = vpop.f32.mrb[10].mxu0 }
  0xf1   :  { %v1436_v58 = vpack.c.bf16 %v1320_v54, %v411_v56  ;;  %1360 = vmatprep.mubr.msk.f32.mxu1 %vm437_vm3, %v258_v57  ;;  %v229_v61 = vpop.f32.mrb[11].mxu0  ;;  %v261_v16 = vmul.f32 %v1299_v59, %v249_v7 }
  0xf2   :  { %v260_v8 = vmul.f32 %v248_v2, %v229_v61 }
  0xf3   :  { %v1323_v60 = vpop.f32.mrb[10].mxu1  ;;  %1437 = vmatprep.subr.bf16.mxu0 %v1436_v58  ;;  %1460 = vmatprep.subr.bf16.mxu1 %v1436_v58 }
  0xf4   :  { %v421_v62 = vpop.f32.mrb[11].mxu1  ;;  %1439 = vmatpush3.bf16.msra.mxu0 %v1436_v58  ;;  %1466 = vmatpush3.bf16.msra.mxu1 %v1436_v58 }
  0xf5   :  { %v1440_v0 = vpack.c.bf16 %v1323_v60, %v421_v62 }
  0xf7   :  { %1441 = vmatprep.subr.bf16.mxu0 %v1440_v0  ;;  %1461 = vmatprep.subr.bf16.mxu1 %v1440_v0 }
  0xf8   :  { %1443 = vmatpush3.bf16.msra.mxu0 %v1440_v0  ;;  %1467 = vmatpush3.bf16.msra.mxu1 %v1440_v0 }
  0xf9   :  { %1445 = vmatprep.subr.bf16.mxu1 %v1444_v34  ;;  %1449 = vmatprep.subr.bf16.mxu0 %v1448_v39 }
  0xfb   :  { %1349 = vmatmul.mubr.msk.f32.vlgmr.msra.gmra.mrb[12].mxu0 %vm437_vm3, %v251_v10  ;;  %1361 = vmatmul.mubr.msk.f32.vlgmr.msra.gmra.mrb[12].mxu1 %vm437_vm3, %v259_v5 }
  0xfc   :  { %1351 = vmatprep.mubr.msk.f32.mxu0 %vm437_vm3, %v252_v6  ;;  %1363 = vmatprep.mubr.msk.f32.mxu1 %vm437_vm3, %v260_v8 }
  0xfd   :  { %1447 = vmatpush3.bf16.msra.mxu1 %v1444_v34  ;;  %1451 = vmatpush3.bf16.msra.mxu0 %v1448_v39 }
  0xfe   :  { %1370 = vmatprep.subr.msk.mxu1 %vm109_vm1, %v625_v35  ;;  %1453 = vmatprep.subr.bf16.mxu0 %v1452_v41 }
  0xff   :  { %1352 = vmatmul.mubr.msk.f32.gmra.mrb[14].mxu0 %vm437_vm3, %v253_v22  ;;  %1364 = vmatmul.mubr.msk.f32.gmra.mrb[14].mxu1 %vm437_vm3, %v261_v16 }
 0x100   :  { %1354 = vmatprep.mubr.msk.f32.mxu0 %vm437_vm3, %v254_v20 }
 0x101   :  { %1371 = vmatpush3.msk.msra.mxu1 %vm109_vm1, %v625_v35  ;;  %1455 = vmatpush3.bf16.msra.mxu0 %v1452_v41 }
 0x103   :  { %1355 = vmatmul.mubr.msk.f32.gmra.mrb[16].mxu0 %vm437_vm3, %v255_v26 }
 0x104   :  { %1357 = vmatprep.mubr.msk.f32.mxu0 %vm437_vm3, %v256_v30 }
 0x107   :  { %1358 = vmatmul.mubr.msk.f32.gmra.mrb[18].mxu0 %vm437_vm3, %v257_v31 }
 0x1ce   :  { %v1350_v43 = vpop.f32.mrb[12].mxu0  ;;  %v1362_v44 = vpop.f32.mrb[12].mxu1 }
 0x1cf   :  { %v546_v45 = vadd.f32 %v1350_v43, %v1156_v42  ;;  %v540_v46 = vpop.f32.mrb[13].mxu0  ;;  %v580_v47 = vpop.f32.mrb[13].mxu1  ;;  %v586_v18 = vadd.f32 %v1362_v44, %v1156_v42 }
 0x1d0   :  { %v541_v48 = vadd.f32 %v1156_v42, %v540_v46  ;;  %v581_v2 = vadd.f32 %v1156_v42, %v580_v47 }
 0x1d1   :  { %v600_v49 = vmax.f32 %v546_v45, 0.0 }
 0x1d2   :  { %v599_v50 = vmax.f32 %v541_v48, 0.0  ;;  %v1353_v51 = vpop.f32.mrb[14].mxu0  ;;  %v1365_v52 = vpop.f32.mrb[14].mxu1  ;;  %v607_v12 = vmax.f32 %v581_v2, 0.0 }
 0x1d3   :  { %v556_v53 = vadd.f32 %v1353_v51, %v1156_v42  ;;  %v550_v54 = vpop.f32.mrb[15].mxu0  ;;  %v590_v55 = vpop.f32.mrb[15].mxu1  ;;  %v612_v58 = vadd.f32 %v600_v49, %v1599_v9  ;;  %v596_v28 = vadd.f32 %v1365_v52, %v1156_v42 }
 0x1d4   :  { %v611_v56 = vadd.f32 %v599_v50, %v1579_v4  ;;  %v551_v57 = vadd.f32 %v1156_v42, %v550_v54  ;;  %v591_v14 = vadd.f32 %v1156_v42, %v590_v55  ;;  %v619_v22 = vadd.f32 %v607_v12, %v1677_v23 }
 0x1d5   :  { %v602_v59 = vmax.f32 %v556_v53, 0.0  ;;  %v610_v31 = vmax.f32 %v596_v28, 0.0 }
 0x1d6   :  { %v601_v60 = vmax.f32 %v551_v57, 0.0  ;;  %v1356_v61 = vpop.f32.mrb[16].mxu0  ;;  %1372 = vmatprep.mubr.msk.f32.mxu1 %vm265_vm0, %v611_v56  ;;  %v609_v24 = vmax.f32 %v591_v14, 0.0 }
 0x1d7   :  { %v566_v62 = vadd.f32 %v1356_v61, %v1156_v42  ;;  %v560_v63 = vpop.f32.mrb[17].mxu0  ;;  %1373 = vmatmul.mubr.msk.f32.vlgmr.msra.gmra.mrb[16].mxu1 %vm265_vm0, %v612_v58  ;;  %v614_v3 = vadd.f32 %v602_v59, %v1625_v13 }
 0x1d8   :  { %v613_v0 = vadd.f32 %v601_v60, %v1609_v11  ;;  %v561_v1 = vadd.f32 %v1156_v42, %v560_v63 }
 0x1d9   :  { %v604_v5 = vmax.f32 %v566_v62, 0.0 }
 0x1da   :  { %v603_v4 = vmax.f32 %v561_v1, 0.0  ;;  %v1359_v6 = vpop.f32.mrb[18].mxu0  ;;  %1375 = vmatprep.mubr.msk.f32.mxu1 %vm265_vm0, %v613_v0  ;;  %v1495_v0 = vmov 0   ;;  %v1183_v1 = vld [vmem:[%s1942_s10] ss:$0 sm:$0xff] }
 0x1db   :  { %v576_v9 = vadd.f32 %v1359_v6, %v1156_v42  ;;  %v570_v7 = vpop.f32.mrb[19].mxu0  ;;  %1376 = vmatmul.mubr.msk.f32.gmra.mrb[18].mxu1 %vm265_vm0, %v614_v3  ;;  %v616_v11 = vadd.f32 %v604_v5, %v1647_v17  ;;  %v621_v17 = vadd.f32 %v609_v24, %v1699_v27  ;;  %1470 = vset.pattern.permute.xlu0 %v1495_v0  ;;  %v1846_v6 = vld [vmem:[%s1943_s11] ss:$0 sm:$0xff]  ;;  %v1050_v0 = vld [vmem:[%s1936_s4 + $0x8] sm:$0xff] }
 0x1dc   :  { %v615_v8 = vadd.f32 %v603_v4, %v1633_v15  ;;  %v571_v10 = vadd.f32 %v1156_v42, %v570_v7  ;;  %v608_v15 = vmax.f32 %v586_v18, 0.0 }
 0x1dd   :  { %v606_v16 = vmax.f32 %v576_v9, 0.0 }
 0x1de   :  { %v605_v20 = vmax.f32 %v571_v10, 0.0  ;;  %1378 = vmatprep.mubr.msk.f32.mxu1 %vm265_vm0, %v615_v8  ;;  %v620_v30 = vadd.f32 %v608_v15, %v1691_v25 }
 0x1df   :  { %1379 = vmatmul.mubr.msk.f32.gmra.mrb[20].mxu1 %vm265_vm0, %v616_v11  ;;  %v618_v26 = vadd.f32 %v606_v16, %v1669_v21  ;;  %v1169_v21 = vld [vmem:[%s1940_s8] ss:$0 sm:$0xff] }
 0x1e0   :  { %v617_v13 = vadd.f32 %v605_v20, %v1655_v19  ;;  %v622_v19 = vadd.f32 %v610_v31, %v1713_v29 }
 0x1e2   :  { %1381 = vmatprep.mubr.msk.f32.mxu1 %vm265_vm0, %v617_v13 }
 0x1e3   :  { %1382 = vmatmul.mubr.msk.f32.gmra.mrb[22].mxu1 %vm265_vm0, %v618_v26 }
 0x1e4   :  { %1384 = vmatprep.mubr.msk.f32.mxu1 %vm265_vm0, %v619_v22 }
 0x1e7   :  { %1385 = vmatmul.mubr.msk.f32.gmra.mrb[24].mxu1 %vm265_vm0, %v620_v30 }
 0x1e8   :  { %1387 = vmatprep.mubr.msk.f32.mxu1 %vm265_vm0, %v621_v17 }
 0x1eb   :  { %1388 = vmatmul.mubr.msk.f32.gmra.mrb[26].mxu1 %vm265_vm0, %v622_v19 }
 0x2aa   :  { %v1374_v23 = vpop.f32.mrb[16].mxu1 }
 0x2ab   :  { %v744_v32 = vadd.f32 %v1374_v23, %v1169_v21  ;;  %v738_v27 = vpop.f32.mrb[17].mxu1 }
 0x2ac   :  { %v739_v33 = vadd.f32 %v1169_v21, %v738_v27 }
 0x2ad   :  { %v798_v35 = vmax.f32 %v744_v32, 0.0 }
 0x2ae   :  { %v797_v34 = vmax.f32 %v739_v33, 0.0  ;;  %v1377_v25 = vpop.f32.mrb[18].mxu1 }
 0x2af   :  { %v754_v36 = vadd.f32 %v1377_v25, %v1169_v21  ;;  %v748_v37 = vpop.f32.mrb[19].mxu1 }
 0x2b0   :  { %v749_v38 = vadd.f32 %v1169_v21, %v748_v37  ;;  %1398 = vmatprep.mubr.msk.f32.mxu0 %vm820_vm4, %v797_v34 }
 0x2b1   :  { %1399 = vmatmul.mubr.msk.f32.vlgmr.msra.gmra.mrb[20].mxu0 %vm820_vm4, %v798_v35  ;;  %v800_v40 = vmax.f32 %v754_v36, 0.0 }
 0x2b2   :  { %v799_v29 = vmax.f32 %v749_v38, 0.0  ;;  %v1380_v39 = vpop.f32.mrb[20].mxu1 }
 0x2b3   :  { %v764_v41 = vadd.f32 %v1380_v39, %v1169_v21  ;;  %v758_v42 = vpop.f32.mrb[21].mxu1 }
 0x2b4   :  { %v759_v43 = vadd.f32 %v1169_v21, %v758_v42  ;;  %1401 = vmatprep.mubr.msk.f32.mxu0 %vm820_vm4, %v799_v29 }
 0x2b5   :  { %1402 = vmatmul.mubr.msk.f32.gmra.mrb[22].mxu0 %vm820_vm4, %v800_v40  ;;  %v802_v46 = vmax.f32 %v764_v41, 0.0 }
 0x2b6   :  { %v801_v44 = vmax.f32 %v759_v43, 0.0  ;;  %v1383_v45 = vpop.f32.mrb[22].mxu1 }
 0x2b7   :  { %v774_v47 = vadd.f32 %v1383_v45, %v1169_v21  ;;  %v768_v48 = vpop.f32.mrb[23].mxu1 }
 0x2b8   :  { %v769_v49 = vadd.f32 %v1169_v21, %v768_v48  ;;  %1404 = vmatprep.mubr.msk.f32.mxu0 %vm820_vm4, %v801_v44 }
 0x2b9   :  { %1405 = vmatmul.mubr.msk.f32.gmra.mrb[24].mxu0 %vm820_vm4, %v802_v46  ;;  %v804_v52 = vmax.f32 %v774_v47, 0.0 }
 0x2ba   :  { %v803_v50 = vmax.f32 %v769_v49, 0.0  ;;  %v1386_v51 = vpop.f32.mrb[24].mxu1 }
 0x2bb   :  { %v784_v53 = vadd.f32 %v1386_v51, %v1169_v21  ;;  %v778_v54 = vpop.f32.mrb[25].mxu1 }
 0x2bc   :  { %v779_v55 = vadd.f32 %v1169_v21, %v778_v54  ;;  %1407 = vmatprep.mubr.msk.f32.mxu0 %vm820_vm4, %v803_v50 }
 0x2bd   :  { %1408 = vmatmul.mubr.msk.f32.gmra.mrb[26].mxu0 %vm820_vm4, %v804_v52  ;;  %v806_v58 = vmax.f32 %v784_v53, 0.0 }
 0x2be   :  { %v805_v56 = vmax.f32 %v779_v55, 0.0  ;;  %v1389_v57 = vpop.f32.mrb[26].mxu1 }
 0x2bf   :  { %v794_v59 = vadd.f32 %v1389_v57, %v1169_v21  ;;  %v788_v60 = vpop.f32.mrb[27].mxu1 }
 0x2c0   :  { %v789_v61 = vadd.f32 %v1169_v21, %v788_v60  ;;  %1410 = vmatprep.mubr.msk.f32.mxu0 %vm820_vm4, %v805_v56 }
 0x2c1   :  { %1411 = vmatmul.mubr.msk.f32.gmra.mrb[28].mxu0 %vm820_vm4, %v806_v58  ;;  %v808_v63 = vmax.f32 %v794_v59, 0.0 }
 0x2c2   :  { %v807_v62 = vmax.f32 %v789_v61, 0.0 }
 0x2c4   :  { %1413 = vmatprep.mubr.msk.f32.mxu0 %vm820_vm4, %v807_v62 }
 0x2c5   :  { %1414 = vmatmul.mubr.msk.f32.gmra.mrb[30].mxu0 %vm820_vm4, %v808_v63  ;;  %v1103_v63 = vld [vmem:[#allocation2] sm:$0x1] }
 0x384   :  { %v1400_v2 = vpop.f32.mrb[20].mxu0 }
 0x385   :  { %v929_v3 = vadd.f32 %v1400_v2, %v1183_v1  ;;  %v923_v5 = vpop.f32.mrb[21].mxu0  ;;  %v1049_v2 = vld [vmem:[%s1936_s4] sm:$0xff] }
 0x386   :  { %v924_v4 = vadd.f32 %v1183_v1, %v923_v5  ;;  %v1051_v5 = vld [vmem:[%s1936_s4 + $0x10] sm:$0xff] }
 0x387   :  { %v983_v9 = vmax.f32 %v929_v3, 0.0 }
 0x388   :  { %v982_v7 = vmax.f32 %v924_v4, 0.0  ;;  %v1403_v8 = vpop.f32.mrb[22].mxu0 }
 0x389   :  { %v939_v10 = vadd.f32 %v1403_v8, %v1183_v1  ;;  %v933_v12 = vpop.f32.mrb[23].mxu0  ;;  %v1002_v14 = vmul.f32 %v1846_v6, %v983_v9 }
 0x38a   :  { %v934_v11 = vadd.f32 %v1183_v1, %v933_v12  ;;  %v1001_v18 = vmul.f32 %v1846_v6, %v982_v7  ;;  %v1052_v12 = vld [vmem:[%s1936_s4 + $0x18] sm:$0xff] }
 0x38b   :  { %v1016_v16 = vsel %vm820_vm4, %v1002_v14, 0.0  ;;  %v985_v20 = vmax.f32 %v939_v10, 0.0  ;;  %v1053_v14 = vld [vmem:[%s1936_s4 + $0x20] sm:$0xff] }
 0x38c   :  { %v984_v13 = vmax.f32 %v934_v11, 0.0  ;;  %1017 = vadd.xlane.f32.xlu0 %v1016_v16  ;;  %v1406_v22 = vpop.f32.mrb[24].mxu0  ;;  %v1013_v17 = vsel %vm820_vm4, %v1001_v18, 0.0 }
 0x38d   :  { %v949_v24 = vadd.f32 %v1406_v22, %v1183_v1  ;;  %v943_v26 = vpop.f32.mrb[25].mxu0  ;;  %v1004_v23 = vmul.f32 %v1846_v6, %v985_v20 }
 0x38e   :  { %v944_v15 = vadd.f32 %v1183_v1, %v943_v26  ;;  %v1003_v28 = vmul.f32 %v1846_v6, %v984_v13  ;;  %v1054_v26 = vld [vmem:[%s1936_s4 + $0x28] sm:$0xff] }
 0x38f   :  { %v987_v30 = vmax.f32 %v949_v24, 0.0  ;;  %v1022_v37 = vsel %vm820_vm4, %v1004_v23, 0.0 }
 0x390   :  { %v986_v31 = vmax.f32 %v944_v15, 0.0  ;;  %v1409_v19 = vpop.f32.mrb[26].mxu0  ;;  %1014 = vadd.xlane.f32.xlu0 %v1013_v17  ;;  %v1019_v21 = vsel %vm820_vm4, %v1003_v28, 0.0  ;;  %v1055_v15 = vld [vmem:[%s1936_s4 + $0x30] sm:$0xff] }
 0x391   :  { %v959_v32 = vadd.f32 %v1409_v19, %v1183_v1  ;;  %v953_v27 = vpop.f32.mrb[27].mxu0  ;;  %1020 = vadd.xlane.f32.xlu1 %v1019_v21  ;;  %v1006_v29 = vmul.f32 %v1846_v6, %v987_v30 }
 0x392   :  { %v954_v33 = vadd.f32 %v1183_v1, %v953_v27  ;;  %v1005_v34 = vmul.f32 %v1846_v6, %v986_v31  ;;  %v1056_v27 = vld [vmem:[%s1936_s4 + $0x38] sm:$0xff] }
 0x393   :  { %v989_v25 = vmax.f32 %v959_v32, 0.0  ;;  %v1028_v47 = vsel %vm820_vm4, %v1006_v29, 0.0 }
 0x394   :  { %v988_v35 = vmax.f32 %v954_v33, 0.0  ;;  %v1412_v36 = vpop.f32.mrb[28].mxu0  ;;  %v1025_v38 = vsel %vm820_vm4, %v1005_v34, 0.0  ;;  %v1057_v33 = vld [vmem:[%s1936_s4 + $0x40] sm:$0xff] }
 0x395   :  { %v969_v39 = vadd.f32 %v1412_v36, %v1183_v1  ;;  %v963_v40 = vpop.f32.mrb[29].mxu0  ;;  %1023 = vadd.xlane.f32.xlu1 %v1022_v37  ;;  %1026 = vadd.xlane.f32.xlu0 %v1025_v38  ;;  %v1008_v43 = vmul.f32 %v1846_v6, %v989_v25 }
 0x396   :  { %v964_v41 = vadd.f32 %v1183_v1, %v963_v40  ;;  %v1007_v42 = vmul.f32 %v1846_v6, %v988_v35  ;;  %v1058_v40 = vld [vmem:[%s1936_s4 + $0x48] sm:$0xff] }
 0x397   :  { %v991_v44 = vmax.f32 %v969_v39, 0.0  ;;  %v1034_v53 = vsel %vm820_vm4, %v1008_v43, 0.0 }
 0x398   :  { %v990_v45 = vmax.f32 %v964_v41, 0.0  ;;  %v1415_v46 = vpop.f32.mrb[30].mxu0  ;;  %v1031_v48 = vsel %vm820_vm4, %v1007_v42, 0.0  ;;  %v1059_v41 = vld [vmem:[%s1936_s4 + $0x50] sm:$0xff] }
 0x399   :  { %v979_v49 = vadd.f32 %v1415_v46, %v1183_v1  ;;  %v973_v50 = vpop.f32.mrb[31].mxu0  ;;  %1029 = vadd.xlane.f32.xlu1 %v1028_v47  ;;  %1032 = vadd.xlane.f32.xlu0 %v1031_v48  ;;  %v1010_v57 = vmul.f32 %v1846_v6, %v991_v44 }
 0x39a   :  { %v974_v51 = vadd.f32 %v1183_v1, %v973_v50  ;;  %v1009_v52 = vmul.f32 %v1846_v6, %v990_v45  ;;  %v1060_v50 = vld [vmem:[%s1936_s4 + $0x58] sm:$0xff]  ;;  %s1496_s4 = smov [#allocation3]  }
 0x39b   :  { %v993_v54 = vmax.f32 %v979_v49, 0.0  ;;  %v1040_v59 = vsel %vm820_vm4, %v1010_v57, 0.0  ;;  %v1109_v57 = vlaneseq  ;;  %s1122_s9 = sshll.u32 %s1496_s4, 4  ;;  %s1123_s9 = int_to_ptr.vmem [resolvable:$true] %s1122_s9 }
 0x39c   :  { %v992_v55 = vmax.f32 %v974_v51, 0.0  ;;  %v1037_v56 = vsel %vm820_vm4, %v1009_v52, 0.0  ;;  %s1471_s8 = scalar_lea.vmem %s1123_s9, 16  ;;  %s1475_s19 = scalar_lea.vmem %s1123_s9, 32 }
 0x39d   :  { %1035 = vadd.xlane.f32.xlu1 %v1034_v53  ;;  %1038 = vadd.xlane.f32.xlu0 %v1037_v56  ;;  %v1012_v61 = vmul.f32 %v1846_v6, %v993_v54  ;;  %p1472_p0 = scmp.ne.s32.totalorder %s1123_s9, %s1471_s8  ;;  %p1476_p1 = scmp.lt.s32.totalorder %s1123_s9, %s1123_s9 }
 0x39e   :  { %v1011_v58 = vmul.f32 %v1846_v6, %v992_v55  ;;  %p1477_p2 = scmp.lt.s32.totalorder %s1475_s19, %s1471_s8 }
 0x39f   :  { %v1046_v62 = vsel %vm820_vm4, %v1012_v61, 0.0  ;;  %v1110_v61 = vshrl.u32 %v1109_v57, 7 }
 0x3a0   :  { %v1043_v60 = vsel %vm820_vm4, %v1011_v58, 0.0  ;;  %p1478_p3 = por %p1477_p2, %p1476_p1 }
 0x3a1   :  { %1041 = vadd.xlane.f32.xlu1 %v1040_v59  ;;  %1044 = vadd.xlane.f32.xlu0 %v1043_v60 }
 0x3a2   :  { %p1479_p4 = pnand %p1478_p3, %p1472_p0 }
 0x3a5   :  { %1047 = vadd.xlane.f32.xlu1 %v1046_v62 }
 0x3b7   :  { %1106 = vperm.xlu0 %1470, %v1103_v63  }
 0x419   :  { %v1018_v1 = vpop.xlane.xlu0 %1017 }
 0x41a   :  { %v1062_v3 = vmul.f32 %v1050_v0, %v1018_v1  ;;  %v1111_v0 = vsub.s32 0, %v1110_v61 }
 0x41c   :  { %v1075_v8 = vsel %vm1073_vm5, %v1062_v3, 0.0 }
 0x41d   :  { %v1015_v4 = vpop.xlane.xlu0 %1014 }
 0x41e   :  { %v1061_v6 = vmul.f32 %v1049_v2, %v1015_v4  ;;  %v1021_v9 = vpop.xlane.xlu1 %1020 }
 0x41f   :  { %v1063_v7 = vmul.f32 %v1051_v5, %v1021_v9 }
 0x420   :  { %v1074_v10 = vsel %vm1073_vm5, %v1061_v6, 0.0 }
 0x421   :  { %v1076_v11 = vadd.f32 %v1075_v8, %v1074_v10  ;;  %v1077_v16 = vsel %vm1073_vm5, %v1063_v7, 0.0 }
 0x422   :  { %v1024_v18 = vpop.xlane.xlu1 %1023  ;;  %v1027_v20 = vpop.xlane.xlu0 %1026 }
 0x423   :  { %v1078_v13 = vadd.f32 %v1077_v16, %v1076_v11  ;;  %v1064_v22 = vmul.f32 %v1052_v12, %v1024_v18  ;;  %v1065_v24 = vmul.f32 %v1053_v14, %v1027_v20 }
 0x425   :  { %v1079_v28 = vsel %vm1073_vm5, %v1064_v22, 0.0  ;;  %v1081_v19 = vsel %vm1073_vm5, %v1065_v24, 0.0 }
 0x426   :  { %v1080_v17 = vadd.f32 %v1079_v28, %v1078_v13  ;;  %v1030_v30 = vpop.xlane.xlu1 %1029  ;;  %v1033_v31 = vpop.xlane.xlu0 %1032 }
 0x427   :  { %v1066_v21 = vmul.f32 %v1054_v26, %v1030_v30  ;;  %v1067_v23 = vmul.f32 %v1055_v15, %v1033_v31 }
 0x428   :  { %v1082_v32 = vadd.f32 %v1081_v19, %v1080_v17 }
 0x429   :  { %v1083_v34 = vsel %vm1073_vm5, %v1066_v21, 0.0  ;;  %v1085_v37 = vsel %vm1073_vm5, %v1067_v23, 0.0 }
 0x42a   :  { %v1084_v25 = vadd.f32 %v1083_v34, %v1082_v32  ;;  %v1036_v35 = vpop.xlane.xlu1 %1035  ;;  %v1039_v36 = vpop.xlane.xlu0 %1038 }
 0x42b   :  { %v1068_v38 = vmul.f32 %v1056_v27, %v1036_v35  ;;  %v1069_v29 = vmul.f32 %v1057_v33, %v1039_v36 }
 0x42c   :  { %v1086_v39 = vadd.f32 %v1085_v37, %v1084_v25 }
 0x42d   :  { %v1087_v42 = vsel %vm1073_vm5, %v1068_v38, 0.0  ;;  %v1089_v46 = vsel %vm1073_vm5, %v1069_v29, 0.0 }
 0x42e   :  { %v1088_v43 = vadd.f32 %v1087_v42, %v1086_v39  ;;  %v1042_v44 = vpop.xlane.xlu1 %1041  ;;  %v1045_v45 = vpop.xlane.xlu0 %1044 }
 0x42f   :  { %v1070_v47 = vmul.f32 %v1058_v40, %v1042_v44  ;;  %v1071_v48 = vmul.f32 %v1059_v41, %v1045_v45 }
 0x430   :  { %v1090_v49 = vadd.f32 %v1089_v46, %v1088_v43 }
 0x431   :  { %v1091_v51 = vsel %vm1073_vm5, %v1070_v47, 0.0  ;;  %v1093_v54 = vsel %vm1073_vm5, %v1071_v48, 0.0 }
 0x432   :  { %v1092_v52 = vadd.f32 %v1091_v51, %v1090_v49  ;;  %v1048_v53 = vpop.xlane.xlu1 %1047 }
 0x433   :  { %v1072_v55 = vmul.f32 %v1060_v50, %v1048_v53 }
 0x434   :  { %v1094_v56 = vadd.f32 %v1093_v54, %v1092_v52 }
 0x435   :  { %v1095_v58 = vsel %vm1073_vm5, %v1072_v55, 0.0 }
 0x436   :  { %v1096_v59 = vadd.f32 %v1095_v58, %v1094_v56  ;;  %v1107_v1 = vpop.permute.xlu0 %1106 }
 0x437   :  { %v1112_v5 = vrot.slane %v1107_v1, %v1111_v0 }
 0x438   :  { %v1097_v60 = vrot.slane %v1096_v59, 4 }
 0x43a   :  { %v1098_v62 = vadd.f32 %v1097_v60, %v1096_v59 }
 0x43c   :  { %v1099_v63 = vrot.slane %v1098_v62, 2 }
 0x43e   :  { %v1100_v2 = vadd.f32 %v1099_v63, %v1098_v62 }
 0x440   :  { %v1101_v3 = vrot.slane %v1100_v2, 1 }
 0x442   :  { %v1102_v4 = vadd.f32 %v1101_v3, %v1100_v2 }
 0x444   :  { %v1113_v6 = vadd.f32 %v1112_v5, %v1102_v4 }
 0x446   :  { %1115 = vst.msk [vmem:[#allocation3] sm:$0x1] %vm1114_vm6, %v1113_v6 }
 0x447   :  { %1482 = shalt.err (!%p1479_p4)
}
 0x448   :  { %s1483_s10 = scalar_lea.hbm %s1945_s13, 16 }
 0x449   :  { %p1484_p5 = scmp.ne.s32.totalorder %s1945_s13, %s1483_s10  ;;  %p1487_p6 = scmp.lt.u32.totalorder %s1483_s10, %s1945_s13 }
 0x44b   :  { %p1489_p7 = pnand %p1487_p6, %p1484_p5 }
 0x44d   :  { %1492 = shalt.err (!%p1489_p7)
}
 0x44e   :  { %1125 = dma.vmem_to_hbm [thread:$0]  %s1123_s9, 16, %s1945_s13, [#allocation4]  }
 0x44f   :  { %1493 = dma.done.wait [#allocation4], 16  }
 0x450   :  { %1494 = vsyncadd [#allocation4], 4294967280 }
 0x451   :  { %1129 = vsyncpa [#allocation4], 1 }

</bundles_post_ra>
